<compile_context>
chip_gen: v7x
topology: tpu7x:2x2x1
jax: 0.10.0
libtpu: 0.0.40
codegen_flags: <defaults>
</compile_context>

<pallas_src>
import functools

import jax
import jax.numpy as jnp
from jax.experimental import pallas as pl
from jax.experimental.pallas import tpu as pltpu


def _predicate_sense_kernel(x_ref, ind_ref, wx_ref, r0_ref, dr_ref, o_ref):
    x = x_ref[...]                                       # [tm, H], native dtype
    ind = ind_ref[...].astype(jnp.float32)               # [tm, 1]  (0.0 / 1.0)

    # Single MXU matmul, accumulate in f32.
    acc = jnp.dot(x, wx_ref[...], preferred_element_type=jnp.float32)  # [tm, C]

    # Folded embedding lookup + bias: one broadcast FMA on the VPU.
    out = acc + r0_ref[...] + ind * dr_ref[...]          # [tm, C] f32

    o_ref[...] = out.astype(o_ref.dtype)


def _round_up(v, m):
    return ((v + m - 1) // m) * m


def _choose_tm(M, H, C, x_bytes, block_m):
    """Row tile: multiple of 8, default 2048, capped by (a) a conservative VMEM
    budget safe on all generations (v5e 16 MiB scoped default, v7x 64 MiB
    physical) and (b) keeping >= 2 grid steps so v7x can use both TCs."""
    if M <= 8:
        return M                                     # single full-array block
    if block_m is not None:
        tm = _round_up(max(int(block_m), 8), 8)
    else:
        tm = 2048
    # Keep at least 2 "parallel" grid steps for v7x megacore sharding.
    tm = min(tm, _round_up((M + 1) // 2, 8))
    tm = max(8, min(tm, _round_up(M, 8)))
    # Double-buffered x + indicator (lane-padded to 128) + out tiles, plus the
    # resident W_x / r0 / dr, must fit with headroom.
    c_lanes = _round_up(C, 128)
    budget = 12 * 1024 * 1024 - (H + 2) * c_lanes * 4
    per_row = 2 * (H * x_bytes + 128 * 4 + c_lanes * x_bytes)
    while tm > 8 and tm * per_row > budget:
        tm = _round_up(tm // 2, 8)
    return tm


@functools.partial(jax.jit, static_argnames=("block_m",))
def predicate_sense_forward(x, is_predicate_id, emb_table, weight, bias, *,
                            block_m=None):
    """x: [B, S, H]; is_predicate_id: [B, S] int (values in {0, 1});
    emb_table: [2, 10]; weight: [C, H+10] (PyTorch Linear layout); bias: [C].
    Returns logits [B, S, C] in x.dtype."""
    B, S, H = x.shape
    C = weight.shape[0]

    # --- Wrapper-side weight prep (tiny arrays, traced once) ---------------
    w = weight.astype(jnp.float32)
    wx = w[:, :H].T.astype(x.dtype)                                  # [H, C]
    we = w[:, H:].T                                                  # [E, C]
    r = emb_table.astype(jnp.float32) @ we + bias.astype(jnp.float32)[None, :]
    r0 = r[0:1, :]                                                   # [1, C] f32
    dr = r[1:2, :] - r[0:1, :]                                       # [1, C] f32

    # --- Token-major flattening (no casts, no padding passes over x) -------
    M = B * S
    x2 = x.reshape(M, H)
    ind2 = is_predicate_id.reshape(M, 1).astype(jnp.int32)
    # TODO(synk): ids >= 2 are treated as 1 here; PyTorch's Embedding(2, ...)
    # would raise. Inputs are assumed to be in {0, 1}.

    x_bytes = jnp.dtype(x.dtype).itemsize
    tm = _choose_tm(M, H, C, x_bytes, block_m)
    grid = (pl.cdiv(M, tm),)   # non-divisible tail block is masked by Pallas

    out = pl.pallas_call(
        _predicate_sense_kernel,
        out_shape=jax.ShapeDtypeStruct((M, C), x.dtype),
        grid_spec=pltpu.PrefetchScalarGridSpec(
            num_scalar_prefetch=0,
            grid=grid,
            in_specs=[
                pl.BlockSpec((tm, H), lambda i: (i, 0)),   # x tile (native dtype)
                pl.BlockSpec((tm, 1), lambda i: (i, 0)),   # indicator tile
                pl.BlockSpec((H, C), lambda i: (0, 0)),    # W_x (resident)
                pl.BlockSpec((1, C), lambda i: (0, 0)),    # r0  (resident)
                pl.BlockSpec((1, C), lambda i: (0, 0)),    # dr  (resident)
            ],
            out_specs=pl.BlockSpec((tm, C), lambda i: (i, 0)),  # unpadded output
        ),
        compiler_params=pltpu.CompilerParams(
            dimension_semantics=("parallel",)),
    )(x2, ind2, wx, r0, dr)

    return out.reshape(B, S, C)


def reference_forward(x, is_predicate_id, emb_table, weight, bias):
    e = emb_table[is_predicate_id]                       # [B, S, E]
    cat = jnp.concatenate([x, e], axis=-1)               # [B, S, H+E]
    return cat @ weight.T + bias                         # [B, S, C]


if __name__ == "__main__":
    key = jax.random.PRNGKey(0)
    B, S, H, E, C = 2, 8, 32, 10, 5

    k1, k2, k3, k4, k5 = jax.random.split(key, 5)
    x = jax.random.normal(k1, (B, S, H), dtype=jnp.float32)
    is_predicate_id = jax.random.bernoulli(k2, 0.3, (B, S)).astype(jnp.int32)

    # Deterministic parameter init (shapes follow the module's __init__).
    emb_table = jax.random.normal(k3, (2, E), dtype=jnp.float32)              # nn.Embedding(2, 10)
    bound = 1.0 / jnp.sqrt(H + E)
    weight = jax.random.uniform(k4, (C, H + E), minval=-bound, maxval=bound)  # nn.Linear(H+10, C)
    bias = jax.random.uniform(k5, (C,), minval=-bound, maxval=bound)

    logits = predicate_sense_forward(x, is_predicate_id, emb_table, weight, bias)
    logits = jax.block_until_ready(logits)

    ref = reference_forward(x, is_predicate_id, emb_table, weight, bias)
    assert logits.shape == (B, S, C), logits.shape
    assert jnp.allclose(logits, ref, atol=1e-4, rtol=1e-4), \
        float(jnp.max(jnp.abs(logits - ref)))

    print("KERNEL_OK")
</pallas_src>

<mosaic_0001>
module attributes {stable_mosaic.version = 11 : i64} {
  func.func @_predicate_sense_kernel(%arg0: i32, %arg1: memref<8x32xf32, #tpu.memory_space<vmem>>, %arg2: memref<8x1xi32, #tpu.memory_space<vmem>>, %arg3: memref<32x5xf32, #tpu.memory_space<vmem>>, %arg4: memref<1x5xf32, #tpu.memory_space<vmem>>, %arg5: memref<1x5xf32, #tpu.memory_space<vmem>>, %arg6: memref<8x5xf32, #tpu.memory_space<vmem>>) attributes {dimension_semantics = [#tpu.dimension_semantics<parallel>], iteration_bounds = array<i64: 2>, scalar_prefetch = 0 : i64, scratch_operands = 0 : i64, tpu.core_type = #tpu.core_type<tc>, window_params = [{transform_indices = @transform_0, window_bounds = array<i64: 8, 32>}, {transform_indices = @transform_1, window_bounds = array<i64: 8, 1>}, {pipeline_mode = #tpu.pipeline_mode<synchronous>, transform_indices = @transform_2, window_bounds = array<i64: 32, 5>}, {pipeline_mode = #tpu.pipeline_mode<synchronous>, transform_indices = @transform_3, window_bounds = array<i64: 1, 5>}, {pipeline_mode = #tpu.pipeline_mode<synchronous>, transform_indices = @transform_4, window_bounds = array<i64: 1, 5>}, {transform_indices = @transform_5, window_bounds = array<i64: 8, 5>}]} {
    %c0 = arith.constant 0 : index
    %c0_0 = arith.constant 0 : index
    %0 = vector.load %arg1[%c0, %c0_0] : memref<8x32xf32, #tpu.memory_space<vmem>>, vector<8x32xf32>
    %c0_1 = arith.constant 0 : index
    %c0_2 = arith.constant 0 : index
    %1 = vector.load %arg2[%c0_1, %c0_2] : memref<8x1xi32, #tpu.memory_space<vmem>>, vector<8x1xi32>
    %2 = arith.sitofp %1 : vector<8x1xi32> to vector<8x1xf32>
    %c0_3 = arith.constant 0 : index
    %c0_4 = arith.constant 0 : index
    %3 = vector.load %arg3[%c0_3, %c0_4] : memref<32x5xf32, #tpu.memory_space<vmem>>, vector<32x5xf32>
    %cst = arith.constant dense<0.000000e+00> : vector<8x5xf32>
    %4 = tpu.matmul %0, %3, %cst {dimension_numbers = #tpu.dot_dimension_numbers<[1], [0], [0], [1], [0, 0, 1, 1], [], []>} : vector<8x32xf32>, vector<32x5xf32>, vector<8x5xf32> -> vector<8x5xf32>
    %c0_5 = arith.constant 0 : index
    %c0_6 = arith.constant 0 : index
    %5 = vector.load %arg4[%c0_5, %c0_6] : memref<1x5xf32, #tpu.memory_space<vmem>>, vector<1x5xf32>
    %6 = vector.broadcast %5 : vector<1x5xf32> to vector<8x5xf32>
    %7 = arith.addf %4, %6 : vector<8x5xf32>
    %c0_7 = arith.constant 0 : index
    %c0_8 = arith.constant 0 : index
    %8 = vector.load %arg5[%c0_7, %c0_8] : memref<1x5xf32, #tpu.memory_space<vmem>>, vector<1x5xf32>
    %9 = vector.broadcast %2 : vector<8x1xf32> to vector<8x5xf32>
    %10 = vector.broadcast %8 : vector<1x5xf32> to vector<8x5xf32>
    %11 = arith.mulf %9, %10 : vector<8x5xf32>
    %12 = arith.addf %7, %11 : vector<8x5xf32>
    %c0_9 = arith.constant 0 : index
    %c0_10 = arith.constant 0 : index
    %13 = vector.load %arg6[%c0_9, %c0_10] : memref<8x5xf32, #tpu.memory_space<vmem>>, vector<8x5xf32>
    tpu.vector_store %arg6[%c0_9, %c0_10], %12 {strides = array<i32>} : memref<8x5xf32, #tpu.memory_space<vmem>>, vector<8x5xf32>,
    return
  }
  func.func @transform_0(%arg0: i32) -> (i32, i32) {
    %c0_i32 = arith.constant 0 : i32
    %c0_i32_0 = arith.constant 0 : i32
    return %arg0, %c0_i32 : i32, i32
  }
  func.func @transform_1(%arg0: i32) -> (i32, i32) {
    %c0_i32 = arith.constant 0 : i32
    %c0_i32_0 = arith.constant 0 : i32
    return %arg0, %c0_i32 : i32, i32
  }
  func.func @transform_2(%arg0: i32) -> (i32, i32) {
    %c0_i32 = arith.constant 0 : i32
    %c0_i32_0 = arith.constant 0 : i32
    %c0_i32_1 = arith.constant 0 : i32
    return %c0_i32, %c0_i32_0 : i32, i32
  }
  func.func @transform_3(%arg0: i32) -> (i32, i32) {
    %c0_i32 = arith.constant 0 : i32
    %c0_i32_0 = arith.constant 0 : i32
    %c0_i32_1 = arith.constant 0 : i32
    return %c0_i32, %c0_i32_0 : i32, i32
  }
  func.func @transform_4(%arg0: i32) -> (i32, i32) {
    %c0_i32 = arith.constant 0 : i32
    %c0_i32_0 = arith.constant 0 : i32
    %c0_i32_1 = arith.constant 0 : i32
    return %c0_i32, %c0_i32_0 : i32, i32
  }
  func.func @transform_5(%arg0: i32) -> (i32, i32) {
    %c0_i32 = arith.constant 0 : i32
    %c0_i32_0 = arith.constant 0 : i32
    return %arg0, %c0_i32 : i32, i32
  }
}

</mosaic_0001>

<bundles_post_ra>
// kernel: predicate_sense_forward.1
= control target key start
LH: loop header
LB: loop body
LE: loop exit
PB: predicated region body
PF: predicated region fallthrough
CT: control target
= control target key end

     0   :  { %s496_s18 = smov 0   ;;  %s534_s0 = inlined_call_operand.vmem [shape: f32[16,32], index: 0, kind: input, shape index: {}]   ;;  %s535_s1 = inlined_call_operand.vmem [shape: s32[16,1], index: 1, kind: input, shape index: {}]   ;;  %s536_s2 = inlined_call_operand.vmem [shape: f32[32,5], index: 2, kind: input, shape index: {}]   ;;  %s537_s3 = inlined_call_operand.vmem [shape: f32[1,5], index: 3, kind: input, shape index: {}]   ;;  %s538_s4 = inlined_call_operand.vmem [shape: f32[1,5], index: 4, kind: input, shape index: {}]   ;;  %s539_s5 = inlined_call_operand.vmem [shape: f32[16,5], index: 5, kind: output, shape index: {}]  }
   0x1 LB: > { %s406_s19 = sadd.s32 4294967295, %s460_s18   ;;  %p410_p0 = scmp.ge.s32.totalorder %s460_s18, 1  ;;  %s460_s18 = sphi %s496_s18, %s15_s18  }
   0x2   : > { %p195_p1 = scmp.lt.s32.totalorder %s460_s18, 3 }
   0x4   : > { %p196_p2 = pnand %p410_p0, %p195_p1 }
   0x5   : > { %v240_v0 = vld [vmem:[%s536_s2] sm:$0xff] (!%p196_p2)  ;;  %v241_v1 = vld [vmem:[%s536_s2 + $0x8] sm:$0xff] (!%p196_p2)  ;;  %v242_v2 = vld [vmem:[%s536_s2 + $0x10] sm:$0xff] (!%p196_p2)  ;;  %v462_v3 = vmov (!%p196_p2), 0.0|0.0   ;;  %vm463_vm0 = vmmov (!%p196_p2), 0   ;;  %v464_v6 = vmov (!%p196_p2), 0.0  }
   0x6   : > { %199 = sbr.rel (%p196_p2) target bundleno = 234 (0xea), region = 40  ;;  %435 = vmatprep.subr.bf16.mxu0 (!%p196_p2), %v462_v3  ;;  %v436_v4 = vpack.c.bf16 (!%p196_p2), %v241_v1, %v240_v0  ;;  %v243_v5 = vld [vmem:[%s536_s2 + $0x18] sm:$0xff] (!%p196_p2)  ;;  %432 = vmatprep.mubr.msk.f32.mxu0 (!%p196_p2), %vm463_vm0, %v464_v6  ;;  %p225_p3 = scmp.lt.s32.totalorder (!%p196_p2), %s406_s19, 1  ;;  %v465_v7 = vmov (!%p196_p2), 0   ;;  %vm251_vm1 = vcmask (!%p196_p2), 261120   ;;  %vm339_vm2 = vcmask (!%p196_p2), 39936  }
   0x7   : > { %453 = vset.pattern.permute.xlu0 (!%p196_p2), %v465_v7  ;;  %v439_v8 = vpack.c.bf16 (!%p196_p2), %v243_v5, %v242_v2  ;;  %v416_v12 = vld [vmem:[%s538_s4] ss:$0 sm:$0xff] (!%p196_p2) }
   0x8   : > { %437 = vmatpush3.bf16.msra.mxu0 (!%p196_p2), %v436_v4  ;;  %v414_v14 = vld [vmem:[%s537_s3] ss:$0 sm:$0xff] (!%p196_p2) }
   0x9   : > { %438 = vmatprep.subr.bf16.mxu0 (!%p196_p2), %v462_v3 }
   0xc   : > { %440 = vmatpush3.bf16.msra.mxu0 (!%p196_p2), %v439_v8 }
   0xd   : > { %s541_s19 = smov (!%p225_p3, %s406_s19), 1 }
   0xe   : > { %s411_s28 = sshll.u32 %s541_s19, 3 }
   0xf   : > { %s228_s6 = scalar_lea.vmem %s534_s0, %s411_s28  ;;  %s232_s9 = scalar_lea.vmem %s535_s1, %s411_s28 }
  0x10   : > { %v237_v9 = vld [vmem:[%s228_s6] sm:$0xff]  ;;  %s236_s16 = scalar_lea.vmem %s539_s5, %s411_s28 }
  0x11   : > { %v238_v10 = vld [vmem:[%s232_s9] sm:$0xff]  ;;  %433 = vmatmul.mubr.msk.f32.vlgmr.msra.gmra.mrb[0].mxu0 %vm251_vm1, %v237_v9 }
  0x12   : > { %v239_v11 = vcvt.s32.f32 %v238_v10 }
  0x14   : > { %328 = vperm.xlu0 %453, %v239_v11  }
  0x93   : > { %v329_v13 = vpop.permute.xlu0 %328 }
  0x94   : > { %v337_v15 = vmul.f32 %v416_v12, %v329_v13 }
  0xe4   : > { %v321_v16 = vpop.f32.mrb[0].mxu0 }
  0xe5   : > { %v322_v17 = vadd.f32 %v414_v14, %v321_v16  ;;  %v434_v18 = vpop.f32.mrb[1].mxu0 }
  0xe7   : > { %v338_v19 = vadd.f32 %v337_v15, %v322_v17 }
  0xe9   : > { %340 = vst.msk [vmem:[%s236_s16] sm:$0xff] %vm339_vm2, %v338_v19 }
  0xea PF: > { %s15_s18 = sadd.s32 1, %s460_s18  }
  0xeb   : > { %p12_p4 = scmp.ge.s32.totalorder %s15_s18, 4  }
  0xed   :  { %14 = sbr.rel (!%p12_p4) target bundleno = 1 (0x1), region = 73 }

</bundles_post_ra>
